<compile_context>
chip_gen: v7x
topology: tpu7x:2x2x1
jax: 0.10.0
libtpu: 0.0.40
codegen_flags: <defaults>
</compile_context>

<pallas_src>
import numpy as np
import jax
import jax.numpy as jnp
from jax.experimental import pallas as pl
from jax.experimental.pallas import tpu as pltpu


def _cdiv(a, b):
    return (a + b - 1) // b


def _round_up(x, m):
    return ((x + m - 1) // m) * m


def _device_kind():
    try:
        return jax.devices()[0].device_kind.lower()
    except Exception:
        return ""


def _num_tensorcores():
    # v7x has 2 TensorCores per chip; v5e/v6e have 1.
    return 2 if "v7" in _device_kind() else 1


def _default_elementwise_dtype(compute_dtype):
    # v5e's VPU has no bf16 path -> keep bias/ReLU in f32 there; elsewhere the
    # VALUs are bf16-capable and bf16 elementwise halves the vreg traffic.
    if "v5" in _device_kind():
        return jnp.float32
    return compute_dtype


def _critic_kernel(x_ref, w1_ref, b1_ref, w2_ref, b2_ref, w3_ref, b3_ref,
                   w4_ref, b4_ref, out_ref):
    cdt = w1_ref.dtype   # MXU operand dtype (bf16 by default)
    edt = b1_ref.dtype   # elementwise dtype: bf16 on v6e/v7x, f32 on v5e

    # Layer 1: cat([s, a]) @ W1 + b1  (concat + bf16 cast done in the wrapper)
    h = jnp.dot(x_ref[...], w1_ref[...], preferred_element_type=jnp.float32)
    h = jnp.maximum(h.astype(edt) + b1_ref[...], 0).astype(cdt)

    # Layer 2
    h = jnp.dot(h, w2_ref[...], preferred_element_type=jnp.float32)
    h = jnp.maximum(h.astype(edt) + b2_ref[...], 0).astype(cdt)

    # Layer 3 (no cast back to cdt: the result feeds the VPU/XLU head, not MXU)
    h = jnp.dot(h, w3_ref[...], preferred_element_type=jnp.float32)
    h = jnp.maximum(h.astype(edt) + b3_ref[...], 0)

    # Layer 4 (256 -> 1): VPU multiply + XLU row reduce in f32 instead of a
    # 1-lane MXU matmul.  (An MXU head is the benchmarkable alternative on
    # v6e/v7x if the XLU turns out to be the saturating slot.)
    q = jnp.sum(h.astype(jnp.float32) * w4_ref[...], axis=-1, keepdims=True) \
        + b4_ref[...]
    out_ref[...] = q.astype(out_ref.dtype)


def critic_forward(state, action, params, *, block_b=4096,
                   compute_dtype=jnp.bfloat16, elementwise_dtype=None):
    """state: (B, S), action: (B, A) -> (B, 1) float32."""
    B, S = state.shape
    A = action.shape[1]
    H = params["w2"].shape[0]
    K = S + A

    if elementwise_dtype is None:
        elementwise_dtype = _default_elementwise_dtype(compute_dtype)

    # Fused layer-1 input: one concat + one cast in the wrapper; the kernel
    # streams the already-bf16 tile straight into the MXU (halves HBM stream).
    x = jnp.concatenate([state, action], axis=1).astype(compute_dtype)

    # Tile selection:
    #  * split B into nearly-equal tiles of <= block_b rows (bounds pad waste)
    #  * on v7x force a multiple-of-2 number of tiles when B > 256 so the
    #    ("parallel",) batch axis actually shards across both TensorCores
    #  * round rows up to the sublane multiple of the streamed dtype
    num_cores = _num_tensorcores()
    n_tiles = max(_cdiv(B, block_b), 1)
    if num_cores > 1 and B > 256:
        n_tiles = _round_up(max(n_tiles, num_cores), num_cores)
    row_align = 16 if jnp.dtype(compute_dtype).itemsize < 4 else 8
    TB = _round_up(_cdiv(B, n_tiles), row_align)
    Bp = n_tiles * TB
    if Bp != B:
        x = jnp.pad(x, ((0, Bp - B), (0, 0)))
    grid = (n_tiles,)

    # MXU operands in bf16; bias/ReLU in elementwise_dtype; f32 head.
    w1 = params["w1"].astype(compute_dtype)
    w2 = params["w2"].astype(compute_dtype)
    w3 = params["w3"].astype(compute_dtype)
    b1 = params["b1"].astype(elementwise_dtype)
    b2 = params["b2"].astype(elementwise_dtype)
    b3 = params["b3"].astype(elementwise_dtype)
    w4_row = params["w4"].reshape(1, H).astype(jnp.float32)
    b4 = params["b4"].reshape(1, 1).astype(jnp.float32)

    const = lambda i: (0, 0)

    flops = 2 * Bp * (K * H + H * H + H * H + H)
    weight_bytes = (w1.size + w2.size + w3.size) * w1.dtype.itemsize \
        + (b1.size + b2.size + b3.size) * b1.dtype.itemsize \
        + (w4_row.size + b4.size) * 4
    bytes_accessed = x.size * x.dtype.itemsize + Bp * 4 + weight_bytes

    out = pl.pallas_call(
        _critic_kernel,
        grid=grid,
        out_shape=jax.ShapeDtypeStruct((Bp, 1), jnp.float32),
        in_specs=[
            pl.BlockSpec((TB, K), lambda i: (i, 0)),   # x tile streams over batch
            pl.BlockSpec((K, H), const),               # weights/biases stay resident
            pl.BlockSpec((1, H), const),
            pl.BlockSpec((H, H), const),
            pl.BlockSpec((1, H), const),
            pl.BlockSpec((H, H), const),
            pl.BlockSpec((1, H), const),
            pl.BlockSpec((1, H), const),
            pl.BlockSpec((1, 1), const),
        ],
        out_specs=pl.BlockSpec((TB, 1), lambda i: (i, 0)),
        compiler_params=pltpu.CompilerParams(
            dimension_semantics=("parallel",),   # megacore split on v7x
            # Explicit budget: double-buffered x/out tiles + compiler-managed
            # intermediates grow with TB; 48 MiB covers block_b=4096 and fits
            # under v7x's 64 MiB physical VMEM.
            vmem_limit_bytes=48 * 1024 * 1024,
        ),
        cost_estimate=pl.CostEstimate(
            flops=flops, transcendentals=0, bytes_accessed=bytes_accessed),
    )(x, w1, b1, w2, b2, w3, b3, w4_row, b4)

    return out[:B]


def init_critic_params(key, state_dim, action_dim, hidden=256):
    """Deterministic init mimicking torch.nn.Linear default (U(-1/sqrt(fan_in), +))."""
    def linear(k, fan_in, fan_out):
        kw, kb = jax.random.split(k)
        bound = 1.0 / np.sqrt(fan_in)
        # Stored transposed relative to torch, i.e. (in, out), so kernel does x @ W.
        w = jax.random.uniform(kw, (fan_in, fan_out), jnp.float32, -bound, bound)
        b = jax.random.uniform(kb, (1, fan_out), jnp.float32, -bound, bound)
        return w, b

    k1, k2, k3, k4 = jax.random.split(key, 4)
    in_dim = state_dim + action_dim
    w1, b1 = linear(k1, in_dim, hidden)
    w2, b2 = linear(k2, hidden, hidden)
    w3, b3 = linear(k3, hidden, hidden)
    w4, b4 = linear(k4, hidden, 1)
    return {"w1": w1, "b1": b1, "w2": w2, "b2": b2,
            "w3": w3, "b3": b3, "w4": w4, "b4": b4}


def critic_reference(state, action, p):
    """Pure-JAX f32 reference (exactly the PyTorch forward)."""
    x = jnp.concatenate([state, action], axis=1)
    h = jnp.maximum(x @ p["w1"] + p["b1"], 0.0)
    h = jnp.maximum(h @ p["w2"] + p["b2"], 0.0)
    h = jnp.maximum(h @ p["w3"] + p["b3"], 0.0)
    return h @ p["w4"] + p["b4"]


if __name__ == "__main__":
    key = jax.random.PRNGKey(0)
    k_params, k_state, k_action = jax.random.split(key, 3)

    batch, state_dim, action_dim = 2, 8, 4
    params = init_critic_params(k_params, state_dim, action_dim)

    state = jax.random.normal(k_state, (batch, state_dim), jnp.float32)
    action = jax.random.normal(k_action, (batch, action_dim), jnp.float32)

    q = critic_forward(state, action, params)
    q = jax.block_until_ready(q)
    assert q.shape == (batch, 1)

    # bf16 MXU operands (and bf16 bias/ReLU on v6e/v7x) with f32 accumulation:
    # compare against the f32 reference with a loosened tolerance.
    q_ref = critic_reference(state, action, params)
    np.testing.assert_allclose(np.asarray(q), np.asarray(q_ref),
                               rtol=5e-2, atol=5e-2)

    print("KERNEL_OK")
</pallas_src>

<mosaic_0001>
module attributes {stable_mosaic.version = 11 : i64} {
  func.func @_critic_kernel(%arg0: i32, %arg1: memref<16x12xbf16, #tpu.memory_space<vmem>>, %arg2: memref<12x256xbf16, #tpu.memory_space<vmem>>, %arg3: memref<1x256xbf16, #tpu.memory_space<vmem>>, %arg4: memref<256x256xbf16, #tpu.memory_space<vmem>>, %arg5: memref<1x256xbf16, #tpu.memory_space<vmem>>, %arg6: memref<256x256xbf16, #tpu.memory_space<vmem>>, %arg7: memref<1x256xbf16, #tpu.memory_space<vmem>>, %arg8: memref<1x256xf32, #tpu.memory_space<vmem>>, %arg9: memref<1x1xf32, #tpu.memory_space<vmem>>, %arg10: memref<16x1xf32, #tpu.memory_space<vmem>>) attributes {dimension_semantics = [#tpu.dimension_semantics<parallel>], iteration_bounds = array<i64: 1>, scalar_prefetch = 0 : i64, scratch_operands = 0 : i64, tpu.core_type = #tpu.core_type<tc>, window_params = [{transform_indices = @transform_0, window_bounds = array<i64: 16, 12>}, {pipeline_mode = #tpu.pipeline_mode<synchronous>, transform_indices = @transform_1, window_bounds = array<i64: 12, 256>}, {pipeline_mode = #tpu.pipeline_mode<synchronous>, transform_indices = @transform_2, window_bounds = array<i64: 1, 256>}, {pipeline_mode = #tpu.pipeline_mode<synchronous>, transform_indices = @transform_3, window_bounds = array<i64: 256, 256>}, {pipeline_mode = #tpu.pipeline_mode<synchronous>, transform_indices = @transform_4, window_bounds = array<i64: 1, 256>}, {pipeline_mode = #tpu.pipeline_mode<synchronous>, transform_indices = @transform_5, window_bounds = array<i64: 256, 256>}, {pipeline_mode = #tpu.pipeline_mode<synchronous>, transform_indices = @transform_6, window_bounds = array<i64: 1, 256>}, {pipeline_mode = #tpu.pipeline_mode<synchronous>, transform_indices = @transform_7, window_bounds = array<i64: 1, 256>}, {pipeline_mode = #tpu.pipeline_mode<synchronous>, transform_indices = @transform_8, window_bounds = array<i64: 1, 1>}, {transform_indices = @transform_9, window_bounds = array<i64: 16, 1>}]} {
    %c0 = arith.constant 0 : index
    %c0_0 = arith.constant 0 : index
    %0 = vector.load %arg1[%c0, %c0_0] : memref<16x12xbf16, #tpu.memory_space<vmem>>, vector<16x12xbf16>
    %c0_1 = arith.constant 0 : index
    %c0_2 = arith.constant 0 : index
    %1 = vector.load %arg2[%c0_1, %c0_2] : memref<12x256xbf16, #tpu.memory_space<vmem>>, vector<12x256xbf16>
    %cst = arith.constant dense<0.000000e+00> : vector<16x256xf32>
    %2 = tpu.matmul %0, %1, %cst {dimension_numbers = #tpu.dot_dimension_numbers<[1], [0], [0], [1], [0, 0, 1, 1], [], []>} : vector<16x12xbf16>, vector<12x256xbf16>, vector<16x256xf32> -> vector<16x256xf32>
    %3 = arith.truncf %2 : vector<16x256xf32> to vector<16x256xbf16>
    %c0_3 = arith.constant 0 : index
    %c0_4 = arith.constant 0 : index
    %4 = vector.load %arg3[%c0_3, %c0_4] : memref<1x256xbf16, #tpu.memory_space<vmem>>, vector<1x256xbf16>
    %5 = vector.broadcast %4 : vector<1x256xbf16> to vector<16x256xbf16>
    %6 = arith.addf %3, %5 : vector<16x256xbf16>
    %cst_5 = arith.constant 0.000000e+00 : bf16
    %7 = vector.broadcast %cst_5 : bf16 to vector<16x256xbf16>
    %8 = arith.maximumf %6, %7 : vector<16x256xbf16>
    %c0_6 = arith.constant 0 : index
    %c0_7 = arith.constant 0 : index
    %9 = vector.load %arg4[%c0_6, %c0_7] : memref<256x256xbf16, #tpu.memory_space<vmem>>, vector<256x256xbf16>
    %cst_8 = arith.constant dense<0.000000e+00> : vector<16x256xf32>
    %10 = tpu.matmul %8, %9, %cst_8 {dimension_numbers = #tpu.dot_dimension_numbers<[1], [0], [0], [1], [0, 0, 1, 1], [], []>} : vector<16x256xbf16>, vector<256x256xbf16>, vector<16x256xf32> -> vector<16x256xf32>
    %11 = arith.truncf %10 : vector<16x256xf32> to vector<16x256xbf16>
    %c0_9 = arith.constant 0 : index
    %c0_10 = arith.constant 0 : index
    %12 = vector.load %arg5[%c0_9, %c0_10] : memref<1x256xbf16, #tpu.memory_space<vmem>>, vector<1x256xbf16>
    %13 = vector.broadcast %12 : vector<1x256xbf16> to vector<16x256xbf16>
    %14 = arith.addf %11, %13 : vector<16x256xbf16>
    %cst_11 = arith.constant 0.000000e+00 : bf16
    %15 = vector.broadcast %cst_11 : bf16 to vector<16x256xbf16>
    %16 = arith.maximumf %14, %15 : vector<16x256xbf16>
    %c0_12 = arith.constant 0 : index
    %c0_13 = arith.constant 0 : index
    %17 = vector.load %arg6[%c0_12, %c0_13] : memref<256x256xbf16, #tpu.memory_space<vmem>>, vector<256x256xbf16>
    %cst_14 = arith.constant dense<0.000000e+00> : vector<16x256xf32>
    %18 = tpu.matmul %16, %17, %cst_14 {dimension_numbers = #tpu.dot_dimension_numbers<[1], [0], [0], [1], [0, 0, 1, 1], [], []>} : vector<16x256xbf16>, vector<256x256xbf16>, vector<16x256xf32> -> vector<16x256xf32>
    %19 = arith.truncf %18 : vector<16x256xf32> to vector<16x256xbf16>
    %c0_15 = arith.constant 0 : index
    %c0_16 = arith.constant 0 : index
    %20 = vector.load %arg7[%c0_15, %c0_16] : memref<1x256xbf16, #tpu.memory_space<vmem>>, vector<1x256xbf16>
    %21 = vector.broadcast %20 : vector<1x256xbf16> to vector<16x256xbf16>
    %22 = arith.addf %19, %21 : vector<16x256xbf16>
    %cst_17 = arith.constant 0.000000e+00 : bf16
    %23 = vector.broadcast %cst_17 : bf16 to vector<16x256xbf16>
    %24 = arith.maximumf %22, %23 : vector<16x256xbf16>
    %25 = arith.extf %24 : vector<16x256xbf16> to vector<16x256xf32>
    %c0_18 = arith.constant 0 : index
    %c0_19 = arith.constant 0 : index
    %26 = vector.load %arg8[%c0_18, %c0_19] : memref<1x256xf32, #tpu.memory_space<vmem>>, vector<1x256xf32>
    %27 = vector.broadcast %26 : vector<1x256xf32> to vector<16x256xf32>
    %28 = arith.mulf %25, %27 : vector<16x256xf32>
    %cst_20 = arith.constant dense<0.000000e+00> : vector<16xf32>
    %29 = vector.multi_reduction <add>, %28, %cst_20 [1] : vector<16x256xf32> to vector<16xf32>
    %30 = vector.shape_cast %29 : vector<16xf32> to vector<16x1xf32>
    %c0_21 = arith.constant 0 : index
    %c0_22 = arith.constant 0 : index
    %31 = vector.load %arg9[%c0_21, %c0_22] : memref<1x1xf32, #tpu.memory_space<vmem>>, vector<1x1xf32>
    %32 = vector.broadcast %31 : vector<1x1xf32> to vector<16x1xf32>
    %33 = arith.addf %30, %32 : vector<16x1xf32>
    %c0_23 = arith.constant 0 : index
    %c0_24 = arith.constant 0 : index
    %34 = vector.load %arg10[%c0_23, %c0_24] : memref<16x1xf32, #tpu.memory_space<vmem>>, vector<16x1xf32>
    tpu.vector_store %arg10[%c0_23, %c0_24], %33 {strides = array<i32>} : memref<16x1xf32, #tpu.memory_space<vmem>>, vector<16x1xf32>,
    return
  }
  func.func @transform_0(%arg0: i32) -> (i32, i32) {
    %c0_i32 = arith.constant 0 : i32
    %c0_i32_0 = arith.constant 0 : i32
    return %arg0, %c0_i32 : i32, i32
  }
  func.func @transform_1(%arg0: i32) -> (i32, i32) {
    %c0_i32 = arith.constant 0 : i32
    %c0_i32_0 = arith.constant 0 : i32
    %c0_i32_1 = arith.constant 0 : i32
    return %c0_i32, %c0_i32_0 : i32, i32
  }
  func.func @transform_2(%arg0: i32) -> (i32, i32) {
    %c0_i32 = arith.constant 0 : i32
    %c0_i32_0 = arith.constant 0 : i32
    %c0_i32_1 = arith.constant 0 : i32
    return %c0_i32, %c0_i32_0 : i32, i32
  }
  func.func @transform_3(%arg0: i32) -> (i32, i32) {
    %c0_i32 = arith.constant 0 : i32
    %c0_i32_0 = arith.constant 0 : i32
    %c0_i32_1 = arith.constant 0 : i32
    return %c0_i32, %c0_i32_0 : i32, i32
  }
  func.func @transform_4(%arg0: i32) -> (i32, i32) {
    %c0_i32 = arith.constant 0 : i32
    %c0_i32_0 = arith.constant 0 : i32
    %c0_i32_1 = arith.constant 0 : i32
    return %c0_i32, %c0_i32_0 : i32, i32
  }
  func.func @transform_5(%arg0: i32) -> (i32, i32) {
    %c0_i32 = arith.constant 0 : i32
    %c0_i32_0 = arith.constant 0 : i32
    %c0_i32_1 = arith.constant 0 : i32
    return %c0_i32, %c0_i32_0 : i32, i32
  }
  func.func @transform_6(%arg0: i32) -> (i32, i32) {
    %c0_i32 = arith.constant 0 : i32
    %c0_i32_0 = arith.constant 0 : i32
    %c0_i32_1 = arith.constant 0 : i32
    return %c0_i32, %c0_i32_0 : i32, i32
  }
  func.func @transform_7(%arg0: i32) -> (i32, i32) {
    %c0_i32 = arith.constant 0 : i32
    %c0_i32_0 = arith.constant 0 : i32
    %c0_i32_1 = arith.constant 0 : i32
    return %c0_i32, %c0_i32_0 : i32, i32
  }
  func.func @transform_8(%arg0: i32) -> (i32, i32) {
    %c0_i32 = arith.constant 0 : i32
    %c0_i32_0 = arith.constant 0 : i32
    %c0_i32_1 = arith.constant 0 : i32
    return %c0_i32, %c0_i32_0 : i32, i32
  }
  func.func @transform_9(%arg0: i32) -> (i32, i32) {
    %c0_i32 = arith.constant 0 : i32
    %c0_i32_0 = arith.constant 0 : i32
    return %arg0, %c0_i32 : i32, i32
  }
}

</mosaic_0001>

<bundles_post_ra>
// kernel: tpu_custom_call.1
= control target key start
LH: loop header
LB: loop body
LE: loop exit
PB: predicated region body
PF: predicated region fallthrough
CT: control target
= control target key end

     0   :  { %s1251_s0 = inlined_call_operand.hbm [shape: bf16[16,12], index: 0, kind: input, shape index: {}]   ;;  %s1252_s1 = inlined_call_operand.hbm [shape: bf16[12,256], index: 1, kind: input, shape index: {}]   ;;  %s1253_s2 = inlined_call_operand.vmem [shape: bf16[1,256], index: 2, kind: input, shape index: {}]   ;;  %s1254_s3 = inlined_call_operand.hbm [shape: bf16[256,256], index: 3, kind: input, shape index: {}]   ;;  %s1255_s4 = inlined_call_operand.vmem [shape: bf16[1,256], index: 4, kind: input, shape index: {}]   ;;  %s1256_s5 = inlined_call_operand.hbm [shape: bf16[256,256], index: 5, kind: input, shape index: {}]   ;;  %s1257_s6 = inlined_call_operand.vmem [shape: bf16[1,256], index: 6, kind: input, shape index: {}]   ;;  %s1258_s7 = inlined_call_operand.vmem [shape: f32[1,256], index: 7, kind: input, shape index: {}]   ;;  %s1259_s8 = inlined_call_operand.<no memory space> [shape: f32[1,1], index: 8, kind: input, shape index: {}]   ;;  %s1260_s9 = inlined_call_operand.vmem [shape: f32[16,1], index: 9, kind: output, shape index: {}]  }
   0x1   :  { %v14_v0 = vstv %s1259_s8 }
   0x2   :  { %15 = vst [vmem:[#allocation2] sm:$0x1] %v14_v0 }
   0x3   :  { %16 = vsyncpa [#allocation4], 0 }
   0x4   :  { %17 = vsyncpa [#allocation6], 0 }
   0x5   :  { %18 = vsyncpa [#allocation9], 0  ;;  %s1085_s11 = smov [#allocation5]   ;;  %s991_s15 = scalar_lea.hbm %s1252_s1, 256 }
   0x6   :  { %s36_s12 = sshll.u32 %s1085_s11, 4  ;;  %p992_p0 = scmp.ne.s32.totalorder %s1252_s1, %s991_s15  ;;  %s37_s12 = int_to_ptr.vmem [resolvable:$true] %s36_s12 }
   0x7   :  { %p995_p1 = scmp.lt.u32.totalorder %s991_s15, %s1252_s1 }
   0x9   :  { %p997_p2 = pnand %p995_p1, %p992_p0 }
   0xb   :  { %1000 = shalt.err (!%p997_p2)
}
   0xc   :  { %s1001_s8 = scalar_lea.vmem %s37_s12, 256  ;;  %p1006_p4 = scmp.lt.s32.totalorder %s37_s12, %s37_s12 }
   0xd   :  { %p1002_p3 = scmp.ne.s32.totalorder %s37_s12, %s1001_s8  ;;  %p1007_p5 = scmp.lt.s32.totalorder %s1001_s8, %s1001_s8 }
   0xf   :  { %p1008_p6 = por %p1007_p5, %p1006_p4 }
  0x11   :  { %p1009_p7 = pnand %p1008_p6, %p1002_p3 }
  0x13   :  { %1012 = shalt.err (!%p1009_p7)
}
  0x14   :  { %s1086_s20 = smov 128   ;;  %s1087_s21 = smov 8  }
  0x15   :  { %42 = dma.hbm_to_vmem [thread:$0]  %s1252_s1, 256, %s37_s12, [#allocation6], %s1086_s20, %s1086_s20, %s1087_s21  }
  0x16   :  { %s1088_s24 = smov [#allocation3]   ;;  %s1013_s28 = scalar_lea.hbm %s1251_s0, 128 }
  0x17   :  { %s24_s25 = sshll.u32 %s1088_s24, 4  ;;  %p1014_p8 = scmp.ne.s32.totalorder %s1251_s0, %s1013_s28  ;;  %s25_s25 = int_to_ptr.vmem [resolvable:$true] %s24_s25 }
  0x18   :  { %p1017_p9 = scmp.lt.u32.totalorder %s1013_s28, %s1251_s0 }
  0x1a   :  { %p1019_p10 = pnand %p1017_p9, %p1014_p8 }
  0x1c   :  { %1022 = shalt.err (!%p1019_p10)
}
  0x1d   :  { %s1023_s13 = scalar_lea.vmem %s25_s25, 128  ;;  %p1028_p12 = scmp.lt.s32.totalorder %s25_s25, %s25_s25 }
  0x1e   :  { %p1024_p11 = scmp.ne.s32.totalorder %s25_s25, %s1023_s13  ;;  %p1029_p13 = scmp.lt.s32.totalorder %s1023_s13, %s1023_s13 }
  0x20   :  { %p1030_p0 = por %p1029_p13, %p1028_p12 }
  0x22   :  { %p1031_p1 = pnand %p1030_p0, %p1024_p11 }
  0x24   :  { %1034 = shalt.err (!%p1031_p1)
}
  0x25   :  { %s1089_s1 = smov 64   ;;  %s1090_s12 = smov 4  }
  0x26   :  { %30 = dma.hbm_to_vmem [thread:$0]  %s1251_s0, 128, %s25_s25, [#allocation4], %s1089_s1, %s1089_s1, %s1090_s12  }
  0x27   :  { %s1091_s16 = smov [#allocation7]   ;;  %s1092_s18 = smov [#allocation8]  }
  0x28   :  { %s50_s17 = sshll.u32 %s1091_s16, 4  ;;  %s64_s19 = sshll.u32 %s1092_s18, 4  ;;  %s51_s17 = int_to_ptr.vmem [resolvable:$true] %s50_s17  ;;  %s1175_s19 = int_to_ptr.vmem [resolvable:$true] %s64_s19 }
  0x29   :  { %s1035_s23 = scalar_lea.hbm %s1254_s3, 4096 }
  0x2a   :  { %p1036_p2 = scmp.ne.s32.totalorder %s1254_s3, %s1035_s23  ;;  %p1039_p3 = scmp.lt.u32.totalorder %s1035_s23, %s1254_s3 }
  0x2c   :  { %p1041_p4 = pnand %p1039_p3, %p1036_p2 }
  0x2e   :  { %1044 = shalt.err (!%p1041_p4)
}
  0x2f   :  { %s1045_s0 = scalar_lea.vmem %s51_s17, 4096  ;;  %p1050_p6 = scmp.lt.s32.totalorder %s51_s17, %s51_s17 }
  0x30   :  { %p1046_p5 = scmp.ne.s32.totalorder %s51_s17, %s1045_s0  ;;  %p1051_p7 = scmp.lt.s32.totalorder %s1045_s0, %s1045_s0 }
  0x32   :  { %p1052_p8 = por %p1051_p7, %p1050_p6 }
  0x34   :  { %p1053_p9 = pnand %p1052_p8, %p1046_p5 }
  0x36   :  { %1056 = shalt.err (!%p1053_p9)
}
  0x37   :  { %56 = dma.hbm_to_vmem [thread:$0]  %s1254_s3, 4096, %s51_s17, [#allocation6], %s1086_s20, %s1086_s20, %s1087_s21  }
  0x38   :  { %s1057_s11 = scalar_lea.hbm %s1256_s5, 4096 }
  0x39   :  { %p1058_p10 = scmp.ne.s32.totalorder %s1256_s5, %s1057_s11  ;;  %p1061_p11 = scmp.lt.u32.totalorder %s1057_s11, %s1256_s5 }
  0x3b   :  { %p1063_p12 = pnand %p1061_p11, %p1058_p10 }
  0x3d   :  { %1066 = shalt.err (!%p1063_p12)
}
  0x3e   :  { %s1067_s15 = scalar_lea.vmem %s1175_s19, 4096  ;;  %p1072_p0 = scmp.lt.s32.totalorder %s1175_s19, %s1175_s19 }
  0x3f   :  { %p1068_p13 = scmp.ne.s32.totalorder %s1175_s19, %s1067_s15  ;;  %p1073_p1 = scmp.lt.s32.totalorder %s1067_s15, %s1067_s15 }
  0x41   :  { %p1074_p2 = por %p1073_p1, %p1072_p0 }
  0x43   :  { %p1075_p3 = pnand %p1074_p2, %p1068_p13 }
  0x45   :  { %1078 = shalt.err (!%p1075_p3)
}
  0x46   :  { %70 = dma.hbm_to_vmem [thread:$0]  %s1256_s5, 4096, %s1175_s19, [#allocation9], %s1086_s20, %s1086_s20, %s1087_s21  }
  0x47   :  { %1079 = dma.done.wait [#allocation4], 128  }
  0x48   :  { %1080 = vsyncadd [#allocation4], 4294967168 }
  0x49   :  { %1081 = dma.done.wait [#allocation6], 4352  }
  0x4a   :  { %1082 = vsyncadd [#allocation6], 4294962944 }
  0x4b   :  { %1083 = dma.done.wait [#allocation9], 4096  }
  0x4c   :  { %1084 = vsyncadd [#allocation9], 4294963200  ;;  %v1093_v1 = vmov 0   ;;  %vm111_vm0 = vcmask 1045504   ;;  %v894_v4 = vld [vmem:[#allocation3] sm:$0xff]   ;;  %vm107_vm1 = vcmask 97280  }
  0x4d   :  { %150 = vmatprep.mubr.bf16.mxu0 %v1093_v1  ;;  %v891_v2 = vld [vmem:[#allocation5 + $0x4] ss:$8 sps:$4 sm:$0x3f]   ;;  %v893_v3 = vld [vmem:[#allocation5] ss:$8 sps:$4 sm:$0x3f]  }
  0x4e   :  { %811 = vmatprep.subr.msk.bf16.mxu0 %vm111_vm0, %v891_v2  ;;  %v113_v5 = vsel %vm111_vm0, %v893_v3, 0  ;;  %v895_v6 = vld [vmem:[#allocation7 + $0x4] ss:$8 sps:$4 sm:$0xff]   ;;  %v897_v7 = vld [vmem:[#allocation7] ss:$8 sps:$4 sm:$0xff]   ;;  %vm798_vm2 = vcmask 7168  }
  0x4f   :  { %119 = vmatpush1.bf16.msra.mxu0 %v113_v5  ;;  %v898_v8 = vld [vmem:[#allocation7 + $0x14] ss:$8 sps:$4 sm:$0xff]   ;;  %397 = vmatprep.subr.bf16.mxu1 %v895_v6  ;;  %v900_v9 = vld [vmem:[#allocation7 + $0x10] ss:$8 sps:$4 sm:$0xff]   ;;  %v901_v10 = vld [vmem:[#allocation7 + $0x24] ss:$8 sps:$4 sm:$0xff]   ;;  %v176_v5 = vlaneseq }
  0x50   :  { %398 = vmatpush1.bf16.msra.mxu1 %v897_v7  ;;  %v903_v11 = vld [vmem:[#allocation7 + $0x20] ss:$8 sps:$4 sm:$0xff]   ;;  %v904_v12 = vld [vmem:[#allocation7 + $0x34] ss:$8 sps:$4 sm:$0xff]   ;;  %v906_v13 = vld [vmem:[#allocation7 + $0x30] ss:$8 sps:$4 sm:$0xff]  }
  0x51   :  { %399 = vmatprep.subr.bf16.mxu1 %v898_v8  ;;  %v907_v14 = vld [vmem:[#allocation7 + $0x44] ss:$8 sps:$4 sm:$0xff]   ;;  %v909_v15 = vld [vmem:[#allocation7 + $0x40] ss:$8 sps:$4 sm:$0xff]   ;;  %v910_v16 = vld [vmem:[#allocation7 + $0x54] ss:$8 sps:$4 sm:$0xff]  }
  0x52   :  { %812 = vmatmul.mubr.msk.bf16.vlgmr.msra.gmra.mrb[0].mxu0 %vm107_vm1, %v894_v4  ;;  %v912_v17 = vld [vmem:[#allocation7 + $0x50] ss:$8 sps:$4 sm:$0xff]   ;;  %v913_v18 = vld [vmem:[#allocation7 + $0x64] ss:$8 sps:$4 sm:$0xff]   ;;  %v915_v19 = vld [vmem:[#allocation7 + $0x60] ss:$8 sps:$4 sm:$0xff]  }
  0x53   :  { %v916_v20 = vld [vmem:[#allocation7 + $0x74] ss:$8 sps:$4 sm:$0xff]   ;;  %v918_v21 = vld [vmem:[#allocation7 + $0x70] ss:$8 sps:$4 sm:$0xff]   ;;  %v919_v22 = vld [vmem:[#allocation7 + $0x84] ss:$8 sps:$4 sm:$0xff]  }
  0x54   :  { %400 = vmatpush1.bf16.msra.mxu1 %v900_v9  ;;  %v921_v23 = vld [vmem:[#allocation7 + $0x80] ss:$8 sps:$4 sm:$0xff]   ;;  %v922_v24 = vld [vmem:[#allocation7 + $0x94] ss:$8 sps:$4 sm:$0xff]   ;;  %v924_v25 = vld [vmem:[#allocation7 + $0x90] ss:$8 sps:$4 sm:$0xff]  }
  0x55   :  { %401 = vmatprep.subr.bf16.mxu1 %v901_v10  ;;  %v925_v26 = vld [vmem:[#allocation7 + $0xa4] ss:$8 sps:$4 sm:$0xff]   ;;  %v927_v27 = vld [vmem:[#allocation7 + $0xa0] ss:$8 sps:$4 sm:$0xff]   ;;  %v928_v28 = vld [vmem:[#allocation7 + $0xb4] ss:$8 sps:$4 sm:$0xff]  }
  0x56   :  { %v930_v29 = vld [vmem:[#allocation7 + $0xb0] ss:$8 sps:$4 sm:$0xff]   ;;  %v931_v30 = vld [vmem:[#allocation7 + $0xc4] ss:$8 sps:$4 sm:$0xff]   ;;  %v933_v31 = vld [vmem:[#allocation7 + $0xc0] ss:$8 sps:$4 sm:$0xff]  }
  0x57   :  { %v934_v32 = vld [vmem:[#allocation7 + $0xd4] ss:$8 sps:$4 sm:$0xff]   ;;  %v936_v33 = vld [vmem:[#allocation7 + $0xd0] ss:$8 sps:$4 sm:$0xff]   ;;  %v937_v34 = vld [vmem:[#allocation7 + $0xe4] ss:$8 sps:$4 sm:$0xff]  }
  0x58   :  { %402 = vmatpush1.bf16.msra.mxu1 %v903_v11  ;;  %v939_v35 = vld [vmem:[#allocation7 + $0xe0] ss:$8 sps:$4 sm:$0xff]   ;;  %v940_v36 = vld [vmem:[#allocation7 + $0xf4] ss:$8 sps:$4 sm:$0xff]   ;;  %v942_v37 = vld [vmem:[#allocation7 + $0xf0] ss:$8 sps:$4 sm:$0xff]  }
  0x59   :  { %403 = vmatprep.subr.bf16.mxu1 %v904_v12  ;;  %v943_v38 = vld [vmem:[#allocation8] ss:$8 sps:$4 sm:$0xff]   ;;  %v945_v39 = vld [vmem:[#allocation8 + $0x4] ss:$8 sps:$4 sm:$0xff]   ;;  %v948_v40 = vld [vmem:[#allocation8 + $0x14] ss:$8 sps:$4 sm:$0xff]  }
  0x5a   :  { %676 = vmatprep.subr.bf16.mxu0 %v945_v39  ;;  %v946_v41 = vld [vmem:[#allocation8 + $0x10] ss:$8 sps:$4 sm:$0xff]   ;;  %v951_v42 = vld [vmem:[#allocation8 + $0x24] ss:$8 sps:$4 sm:$0xff]   ;;  %v949_v43 = vld [vmem:[#allocation8 + $0x20] ss:$8 sps:$4 sm:$0xff]  }
  0x5b   :  { %677 = vmatpush1.bf16.msra.mxu0 %v943_v38  ;;  %v954_v44 = vld [vmem:[#allocation8 + $0x34] ss:$8 sps:$4 sm:$0xff]   ;;  %v952_v45 = vld [vmem:[#allocation8 + $0x30] ss:$8 sps:$4 sm:$0xff]   ;;  %v957_v46 = vld [vmem:[#allocation8 + $0x44] ss:$8 sps:$4 sm:$0xff]  }
  0x5c   :  { %404 = vmatpush1.bf16.msra.mxu1 %v906_v13  ;;  %678 = vmatprep.subr.bf16.mxu0 %v948_v40  ;;  %v955_v47 = vld [vmem:[#allocation8 + $0x40] ss:$8 sps:$4 sm:$0xff]   ;;  %v960_v48 = vld [vmem:[#allocation8 + $0x54] ss:$8 sps:$4 sm:$0xff]   ;;  %v958_v49 = vld [vmem:[#allocation8 + $0x50] ss:$8 sps:$4 sm:$0xff]  }
  0x5d   :  { %405 = vmatprep.subr.bf16.mxu1 %v907_v14  ;;  %v963_v50 = vld [vmem:[#allocation8 + $0x64] ss:$8 sps:$4 sm:$0xff]   ;;  %v961_v51 = vld [vmem:[#allocation8 + $0x60] ss:$8 sps:$4 sm:$0xff]   ;;  %v966_v52 = vld [vmem:[#allocation8 + $0x74] ss:$8 sps:$4 sm:$0xff]  }
  0x5e   :  { %v964_v53 = vld [vmem:[#allocation8 + $0x70] ss:$8 sps:$4 sm:$0xff]   ;;  %v969_v54 = vld [vmem:[#allocation8 + $0x84] ss:$8 sps:$4 sm:$0xff]   ;;  %v967_v55 = vld [vmem:[#allocation8 + $0x80] ss:$8 sps:$4 sm:$0xff]  }
  0x5f   :  { %679 = vmatpush1.bf16.msra.mxu0 %v946_v41  ;;  %v972_v56 = vld [vmem:[#allocation8 + $0x94] ss:$8 sps:$4 sm:$0xff]   ;;  %v970_v57 = vld [vmem:[#allocation8 + $0x90] ss:$8 sps:$4 sm:$0xff]   ;;  %v975_v58 = vld [vmem:[#allocation8 + $0xa4] ss:$8 sps:$4 sm:$0xff]  }
  0x60   :  { %406 = vmatpush1.bf16.msra.mxu1 %v909_v15  ;;  %680 = vmatprep.subr.bf16.mxu0 %v951_v42  ;;  %v973_v59 = vld [vmem:[#allocation8 + $0xa0] ss:$8 sps:$4 sm:$0xff]   ;;  %v978_v60 = vld [vmem:[#allocation8 + $0xb4] ss:$8 sps:$4 sm:$0xff]   ;;  %v976_v61 = vld [vmem:[#allocation8 + $0xb0] ss:$8 sps:$4 sm:$0xff]  }
  0x61   :  { %407 = vmatprep.subr.bf16.mxu1 %v910_v16  ;;  %v981_v62 = vld [vmem:[#allocation8 + $0xc4] ss:$8 sps:$4 sm:$0xff]   ;;  %v979_v63 = vld [vmem:[#allocation8 + $0xc0] ss:$8 sps:$4 sm:$0xff]   ;;  %v984_v0 = vld [vmem:[#allocation8 + $0xd4] ss:$8 sps:$4 sm:$0xff]  }
  0x62   :  { %v982_v2 = vld [vmem:[#allocation8 + $0xd0] ss:$8 sps:$4 sm:$0xff]   ;;  %v1094_v3 = vmov 1966171168   ;;  %v1213_v7 = vshrl.u32 %v176_v5, 7 }
  0x63   :  { %681 = vmatpush1.bf16.msra.mxu0 %v949_v43  ;;  %v174_v4 = vunpack.c.l.s4 %v1094_v3  ;;  %v813_v8 = vld.sshfl [vmem:[%s1253_s2] sm:$0x11 pattern:$0x75316420] }
  0x64   :  { %408 = vmatpush1.bf16.msra.mxu1 %v912_v17  ;;  %682 = vmatprep.subr.bf16.mxu0 %v954_v44  ;;  %v172_v10 = vcombine.high %v813_v8, %v813_v8  ;;  %v1220_v14 = vsub.s32 0, %v1213_v7 }
  0x65   :  { %409 = vmatprep.subr.bf16.mxu1 %v913_v18  ;;  %v175_v6 = vunpack.c.0.s8 %v174_v4 }
  0x67   :  { %683 = vmatpush1.bf16.msra.mxu0 %v952_v45  ;;  %v178_v9 = vsub.s32 %v175_v6, %v1213_v7 }
  0x68   :  { %410 = vmatpush1.bf16.msra.mxu1 %v915_v19  ;;  %684 = vmatprep.subr.bf16.mxu0 %v957_v46 }
  0x69   :  { %411 = vmatprep.subr.bf16.mxu1 %v916_v20  ;;  %v179_v11 = vrot.slane %v813_v8, %v178_v9  ;;  %v186_v12 = vrot.slane %v172_v10, %v178_v9 }
  0x6b   :  { %685 = vmatpush1.bf16.msra.mxu0 %v955_v47  ;;  %v188_v13 = vpack.i.b16 %v179_v11, %v179_v11  ;;  %v195_v15 = vpack.i.b16 %v186_v12, %v186_v12 }
  0x6c   :  { %412 = vmatpush1.bf16.msra.mxu1 %v918_v21  ;;  %686 = vmatprep.subr.bf16.mxu0 %v960_v48 }
  0x6d   :  { %413 = vmatprep.subr.bf16.mxu1 %v919_v22  ;;  %v193_v18 = vrot.slane %v188_v13, %v1220_v14  ;;  %v200_v20 = vrot.slane %v195_v15, %v1220_v14 }
  0x6f   :  { %687 = vmatpush1.bf16.msra.mxu0 %v958_v49 }
  0x70   :  { %414 = vmatpush1.bf16.msra.mxu1 %v921_v23  ;;  %688 = vmatprep.subr.bf16.mxu0 %v963_v50  ;;  %v879_v50 = vld.sshfl [vmem:[%s1257_s6] sm:$0x11 pattern:$0x75316420] }
  0x71   :  { %415 = vmatprep.subr.bf16.mxu1 %v922_v24 }
  0x73   :  { %689 = vmatpush1.bf16.msra.mxu0 %v961_v51  ;;  %v730_v51 = vcombine.high %v879_v50, %v879_v50 }
  0x74   :  { %416 = vmatpush1.bf16.msra.mxu1 %v924_v25  ;;  %690 = vmatprep.subr.bf16.mxu0 %v966_v52  ;;  %v737_v52 = vrot.slane %v879_v50, %v178_v9 }
  0x75   :  { %417 = vmatprep.subr.bf16.mxu1 %v925_v26 }
  0x77   :  { %691 = vmatpush1.bf16.msra.mxu0 %v964_v53  ;;  %v744_v53 = vrot.slane %v730_v51, %v178_v9 }
  0x78   :  { %418 = vmatpush1.bf16.msra.mxu1 %v927_v27  ;;  %692 = vmatprep.subr.bf16.mxu0 %v969_v54  ;;  %v746_v54 = vpack.i.b16 %v737_v52, %v737_v52 }
  0x79   :  { %419 = vmatprep.subr.bf16.mxu1 %v928_v28  ;;  %v987_v28 = vld [vmem:[#allocation8 + $0xe4] ss:$8 sps:$4 sm:$0xff]  }
  0x7b   :  { %693 = vmatpush1.bf16.msra.mxu0 %v967_v55  ;;  %v753_v55 = vpack.i.b16 %v744_v53, %v744_v53 }
  0x7c   :  { %420 = vmatpush1.bf16.msra.mxu1 %v930_v29  ;;  %694 = vmatprep.subr.bf16.mxu0 %v972_v56  ;;  %v985_v29 = vld [vmem:[#allocation8 + $0xe0] ss:$8 sps:$4 sm:$0xff]  }
  0x7d   :  { %421 = vmatprep.subr.bf16.mxu1 %v931_v30  ;;  %v990_v30 = vld [vmem:[#allocation8 + $0xf4] ss:$8 sps:$4 sm:$0xff]  }
  0x7f   :  { %695 = vmatpush1.bf16.msra.mxu0 %v970_v57 }
  0x80   :  { %422 = vmatpush1.bf16.msra.mxu1 %v933_v31  ;;  %696 = vmatprep.subr.bf16.mxu0 %v975_v58  ;;  %v988_v31 = vld [vmem:[#allocation8 + $0xf0] ss:$8 sps:$4 sm:$0xff]   ;;  %v751_v58 = vrot.slane %v746_v54, %v1220_v14 }
  0x81   :  { %423 = vmatprep.subr.bf16.mxu1 %v934_v32  ;;  %v846_v32 = vld.sshfl [vmem:[%s1255_s4] sm:$0x11 pattern:$0x75316420] }
  0x83   :  { %697 = vmatpush1.bf16.msra.mxu0 %v973_v59 }
  0x84   :  { %424 = vmatpush1.bf16.msra.mxu1 %v936_v33  ;;  %698 = vmatprep.subr.bf16.mxu0 %v978_v60  ;;  %v451_v33 = vcombine.high %v846_v32, %v846_v32  ;;  %v758_v60 = vrot.slane %v753_v55, %v1220_v14 }
  0x85   :  { %425 = vmatprep.subr.bf16.mxu1 %v937_v34  ;;  %v458_v34 = vrot.slane %v846_v32, %v178_v9 }
  0x87   :  { %699 = vmatpush1.bf16.msra.mxu0 %v976_v61 }
  0x88   :  { %426 = vmatpush1.bf16.msra.mxu1 %v939_v35  ;;  %700 = vmatprep.subr.bf16.mxu0 %v981_v62  ;;  %v465_v35 = vrot.slane %v451_v33, %v178_v9 }
  0x89   :  { %427 = vmatprep.subr.bf16.mxu1 %v940_v36  ;;  %v467_v36 = vpack.i.b16 %v458_v34, %v458_v34 }
  0x8b   :  { %701 = vmatpush1.bf16.msra.mxu0 %v979_v63  ;;  %v472_v40 = vrot.slane %v467_v36, %v1220_v14 }
  0x8c   :  { %428 = vmatpush1.bf16.msra.mxu1 %v942_v37  ;;  %702 = vmatprep.subr.bf16.mxu0 %v984_v0  ;;  %v474_v37 = vpack.i.b16 %v465_v35, %v465_v35  ;;  %v767_v0 = vld [vmem:[%s1258_s7] sm:$0x3] }
  0x8d   :  { %v772_v6 = vrot.slane %v767_v0, %v1220_v14 }
  0x8e   :  { %v479_v42 = vrot.slane %v474_v37, %v1220_v14 }
  0x8f   :  { %703 = vmatpush1.bf16.msra.mxu0 %v982_v2  ;;  %v775_v2 = vsub.s32 1, %v1213_v7  ;;  %v880_v7 = vld [vmem:[#allocation2] ss:$0 sm:$0xff] }
  0x90   :  { %704 = vmatprep.subr.bf16.mxu0 %v987_v28 }
  0x91   :  { %v776_v9 = vrot.slane %v767_v0, %v775_v2 }
  0x93   :  { %705 = vmatpush1.bf16.msra.mxu0 %v985_v29 }
  0x94   :  { %706 = vmatprep.subr.bf16.mxu0 %v990_v30 }
  0x97   :  { %707 = vmatpush1.bf16.msra.mxu0 %v988_v31 }
 0x125   :  { %v152_v16 = vpop.f32.mrb[0].mxu0 }
 0x126   :  { %v154_v17 = vpop.f32.mrb[1].mxu0 }
 0x127   :  { %v156_v19 = vpop.f32.mrb[2].mxu0 }
 0x128   :  { %v161_v21 = vpack.c.bf16 %v156_v19, %v152_v16  ;;  %v158_v22 = vpop.f32.mrb[3].mxu0 }
 0x129   :  { %v162_v23 = vpack.c.bf16 %v158_v22, %v154_v17 }
 0x12a   :  { %v201_v24 = vadd.bf16 %v193_v18, %v161_v21 }
 0x12b   :  { %v202_v25 = vadd.bf16 %v200_v20, %v162_v23 }
 0x12c   :  { %v203_v27 = vmax.bf16 %v1093_v1, %v201_v24 }
 0x12d   :  { %v204_v26 = vmax.bf16 %v1093_v1, %v202_v25 }
 0x12f   :  { %429 = vmatprep.mubr.bf16.mxu1 %v204_v26 }
 0x130   :  { %430 = vmatmul.mubr.bf16.vlgmr.msra.gmra.mrb[0].mxu1 %v203_v27 }
 0x203   :  { %v431_v38 = vpop.f32.mrb[0].mxu1 }
 0x204   :  { %v433_v39 = vpop.f32.mrb[1].mxu1 }
 0x205   :  { %v435_v41 = vpop.f32.mrb[2].mxu1 }
 0x206   :  { %v440_v43 = vpack.c.bf16 %v435_v41, %v431_v38  ;;  %v437_v44 = vpop.f32.mrb[3].mxu1 }
 0x207   :  { %v441_v45 = vpack.c.bf16 %v437_v44, %v433_v39 }
 0x208   :  { %v480_v46 = vadd.bf16 %v472_v40, %v440_v43 }
 0x209   :  { %v481_v47 = vadd.bf16 %v479_v42, %v441_v45 }
 0x20a   :  { %v482_v49 = vmax.bf16 %v1093_v1, %v480_v46 }
 0x20b   :  { %v483_v48 = vmax.bf16 %v1093_v1, %v481_v47 }
 0x20d   :  { %708 = vmatprep.mubr.bf16.mxu0 %v483_v48 }
 0x20e   :  { %709 = vmatmul.mubr.bf16.vlgmr.msra.gmra.mrb[4].mxu0 %v482_v49 }
 0x2e1   :  { %v710_v56 = vpop.f32.mrb[4].mxu0 }
 0x2e2   :  { %v712_v57 = vpop.f32.mrb[5].mxu0 }
 0x2e3   :  { %v714_v59 = vpop.f32.mrb[6].mxu0 }
 0x2e4   :  { %v719_v61 = vpack.c.bf16 %v714_v59, %v710_v56  ;;  %v716_v62 = vpop.f32.mrb[7].mxu0 }
 0x2e5   :  { %v720_v63 = vpack.c.bf16 %v716_v62, %v712_v57 }
 0x2e6   :  { %v759_v3 = vadd.bf16 %v751_v58, %v719_v61 }
 0x2e7   :  { %v760_v4 = vadd.bf16 %v758_v60, %v720_v63 }
 0x2e8   :  { %v761_v5 = vmax.bf16 %v1093_v1, %v759_v3 }
 0x2e9   :  { %v762_v8 = vmax.bf16 %v1093_v1, %v760_v4 }
 0x2ea   :  { %v763_v10 = vunpack.c.l.bf16 %v761_v5  ;;  %v765_v11 = vunpack.c.h.bf16 %v761_v5 }
 0x2eb   :  { %v764_v12 = vunpack.c.l.bf16 %v762_v8  ;;  %v766_v13 = vunpack.c.h.bf16 %v762_v8 }
 0x2ec   :  { %v779_v15 = vmul.f32 %v772_v6, %v763_v10  ;;  %v781_v16 = vmul.f32 %v772_v6, %v765_v11 }
 0x2ed   :  { %v780_v17 = vmul.f32 %v776_v9, %v764_v12  ;;  %v782_v18 = vmul.f32 %v776_v9, %v766_v13 }
 0x2ef   :  { %v783_v19 = vadd.f32 %v780_v17, %v779_v15  ;;  %v786_v20 = vadd.f32 %v782_v18, %v781_v16 }
 0x2f1   :  { %784 = vadd.xlane.f32.xlu0 %v783_v19 }
 0x2f5   :  { %787 = vadd.xlane.f32.xlu0 %v786_v20 }
 0x37e   :  { %v785_v21 = vpop.xlane.xlu0 %784 }
 0x37f   :  { %v796_v22 = vadd.f32 %v880_v7, %v785_v21 }
 0x381   :  { %799 = vst.msk [vmem:[%s1260_s9] sm:$0xff] %vm798_vm2, %v796_v22 }
 0x382   :  { %v788_v1 = vpop.xlane.xlu0 %787 }
 0x383   :  { %v797_v14 = vadd.f32 %v880_v7, %v788_v1 }
 0x385   :  { %800 = vst.msk [vmem:[%s1260_s9 + $0x8] sm:$0xff] %vm798_vm2, %v797_v14 }
 0x386   :  { %805 = vsyncpa [#allocation4], 1 }
 0x387   :  { %806 = vsyncpa [#allocation6], 1 }
 0x388   :  { %807 = vsyncpa [#allocation9], 1 }

</bundles_post_ra>
